<compile_context>
chip_gen: v7x
topology: tpu7x:2x2x1
jax: 0.10.0
libtpu: 0.0.40
codegen_flags: <defaults>
</compile_context>

<pallas_src>
import functools

import jax
import jax.numpy as jnp
from jax.experimental import pallas as pl
from jax.experimental.pallas import tpu as pltpu


def _round_up(x, m):
    return ((x + m - 1) // m) * m


def mlp_kernel(x_ref, w1_ref, b1_ref, w2_ref, o_ref, *, d_out_valid, d_out_pad):
    # x_ref : [TB, D_in_p]      bf16 VMEM (batch tile)
    # w1_ref: [D_in_p, H_p]     bf16 VMEM (fc1.weight^T, grid-resident)
    # b1_ref: [1, H_p]          f32  VMEM
    # w2_ref: [H_p, D_out_p]    bf16 VMEM (fc2.weight^T, grid-resident)
    # o_ref : [TB, D_out_p]     f32  VMEM
    x = x_ref[...]

    # fc1: bf16 operands, f32 accumulation on the MXU; bias + ReLU in f32.
    h = jnp.dot(x, w1_ref[...], preferred_element_type=jnp.float32) + b1_ref[...]
    h = jnp.maximum(h, 0.0)

    # fc2 (no bias): bf16 operands, f32 accumulation.
    logits = jnp.dot(h.astype(w2_ref.dtype), w2_ref[...],
                     preferred_element_type=jnp.float32)

    # Mask padded output lanes so they contribute nothing to the softmax.
    if d_out_valid != d_out_pad:
        lane = jax.lax.broadcasted_iota(jnp.int32, logits.shape, dimension=1)
        logits = jnp.where(lane < d_out_valid, logits, -jnp.inf)

    # Softmax over features (dim 1), all in f32; reciprocal on the EUP.
    m = jnp.max(logits, axis=1, keepdims=True)
    e = jnp.exp(logits - m)
    denom = jnp.sum(e, axis=1, keepdims=True)
    o_ref[...] = (e * pl.reciprocal(denom, approx=True)).astype(o_ref.dtype)


def mlp_forward(x, w1, b1, w2, *, batch_tile=256):
    """Eval-mode MLP forward: softmax(relu(x @ w1.T + b1) @ w2.T, axis=1).

    x : [B, D_in] f32, w1: [H, D_in] (fc1.weight), b1: [H], w2: [D_out, H].
    Returns [B, D_out] f32.
    """
    B, d_in = x.shape
    h_dim = w1.shape[0]
    d_out = w2.shape[0]

    # Lane-dense padding: features -> multiples of 128, batch -> tile multiple.
    d_in_p = _round_up(d_in, 128)
    h_p = _round_up(h_dim, 128)
    d_out_p = _round_up(d_out, 128)
    tb = min(batch_tile, _round_up(B, 8))   # batch tile (sublane multiple of 8)
    b_p = _round_up(B, tb)
    # VMEM note (v7x, 64 MiB phys / 32 MiB default scoped): weights are
    # (d_in_p*h_p + h_p*d_out_p)*2B + double-buffered (tb*d_in_p + tb*d_out_p)*?B
    # + tb*h_p*4B intermediate; batch_tile<=256 stays far under budget for the
    # sizes this module targets. Raise vmem_limit_bytes if h_p grows large.

    # Pre-transpose weights to [in, out]; zero padding is neutral through the
    # matmuls / zero-bias / ReLU, and padded softmax lanes are masked in-kernel.
    x_p = jnp.zeros((b_p, d_in_p), jnp.bfloat16).at[:B, :d_in].set(
        x.astype(jnp.bfloat16))
    w1_p = jnp.zeros((d_in_p, h_p), jnp.bfloat16).at[:d_in, :h_dim].set(
        w1.T.astype(jnp.bfloat16))
    b1_p = jnp.zeros((1, h_p), jnp.float32).at[:, :h_dim].set(
        b1.astype(jnp.float32)[None, :])
    w2_p = jnp.zeros((h_p, d_out_p), jnp.bfloat16).at[:h_dim, :d_out].set(
        w2.T.astype(jnp.bfloat16))

    kernel = functools.partial(mlp_kernel, d_out_valid=d_out, d_out_pad=d_out_p)

    out_p = pl.pallas_call(
        kernel,
        out_shape=jax.ShapeDtypeStruct((b_p, d_out_p), jnp.float32),
        grid_spec=pltpu.PrefetchScalarGridSpec(
            num_scalar_prefetch=0,
            grid=(b_p // tb,),
            in_specs=[
                pl.BlockSpec((tb, d_in_p), lambda i: (i, 0)),      # stream x tiles
                pl.BlockSpec((d_in_p, h_p), lambda i: (0, 0)),     # w1 resident
                pl.BlockSpec((1, h_p), lambda i: (0, 0)),          # b1 resident
                pl.BlockSpec((h_p, d_out_p), lambda i: (0, 0)),    # w2 resident
            ],
            out_specs=pl.BlockSpec((tb, d_out_p), lambda i: (i, 0)),
        ),
        compiler_params=pltpu.CompilerParams(
            dimension_semantics=("parallel",),
        ),
    )(x_p, w1_p, b1_p, w2_p)

    # Strip batch / feature padding.
    return out_p[:B, :d_out]


def xavier_uniform(key, fan_out, fan_in, dtype=jnp.float32):
    # Matches nn.init.xavier_uniform_ for a Linear weight of shape (fan_out, fan_in).
    limit = jnp.sqrt(6.0 / (fan_in + fan_out))
    return jax.random.uniform(key, (fan_out, fan_in), dtype, minval=-limit, maxval=limit)


if __name__ == "__main__":
    # Module hyperparameters (small, consistent with the forward pass).
    in_dim, hidden_dim, out_dim, dropout = 16, 32, 8, 0.5
    batch = 8

    key = jax.random.PRNGKey(0)
    k_x, k_w1, k_w2 = jax.random.split(key, 3)

    # Deterministic parameter init (mirrors the PyTorch __init__).
    w1 = xavier_uniform(k_w1, hidden_dim, in_dim)   # fc1.weight: (hidden, in)
    b1 = jnp.zeros((hidden_dim,), jnp.float32)      # fc1.bias = 0
    w2 = xavier_uniform(k_w2, out_dim, hidden_dim)  # fc2.weight: (out, hidden)

    x = jax.random.normal(k_x, (batch, in_dim), jnp.float32)

    out = mlp_forward(x, w1, b1, w2)
    jax.block_until_ready(out)

    # Reference in plain JAX with matching bf16-operand / f32-accumulate matmuls
    # (eval mode: dropout is the identity).
    xb = x.astype(jnp.bfloat16).astype(jnp.float32)
    w1b = w1.T.astype(jnp.bfloat16).astype(jnp.float32)
    w2b = w2.T.astype(jnp.bfloat16).astype(jnp.float32)
    h_ref = jnp.maximum(xb @ w1b + b1[None, :], 0.0)
    logits_ref = h_ref.astype(jnp.bfloat16).astype(jnp.float32) @ w2b
    ref = jax.nn.softmax(logits_ref, axis=1)

    assert out.shape == (batch, out_dim)
    assert jnp.allclose(out, ref, atol=5e-3, rtol=5e-3), float(jnp.max(jnp.abs(out - ref)))
    assert jnp.allclose(jnp.sum(out, axis=1), 1.0, atol=5e-3)

    print("KERNEL_OK")
</pallas_src>

<mosaic_0001>
module attributes {stable_mosaic.version = 11 : i64} {
  func.func @mlp_kernel(%arg0: i32, %arg1: memref<8x128xbf16, #tpu.memory_space<vmem>>, %arg2: memref<128x128xbf16, #tpu.memory_space<vmem>>, %arg3: memref<1x128xf32, #tpu.memory_space<vmem>>, %arg4: memref<128x128xbf16, #tpu.memory_space<vmem>>, %arg5: memref<8x128xf32, #tpu.memory_space<vmem>>) attributes {dimension_semantics = [#tpu.dimension_semantics<parallel>], iteration_bounds = array<i64: 1>, scalar_prefetch = 0 : i64, scratch_operands = 0 : i64, tpu.core_type = #tpu.core_type<tc>, window_params = [{transform_indices = @transform_0, window_bounds = array<i64: 8, 128>}, {pipeline_mode = #tpu.pipeline_mode<synchronous>, transform_indices = @transform_1, window_bounds = array<i64: 128, 128>}, {pipeline_mode = #tpu.pipeline_mode<synchronous>, transform_indices = @transform_2, window_bounds = array<i64: 1, 128>}, {pipeline_mode = #tpu.pipeline_mode<synchronous>, transform_indices = @transform_3, window_bounds = array<i64: 128, 128>}, {transform_indices = @transform_4, window_bounds = array<i64: 8, 128>}]} {
    %c0 = arith.constant 0 : index
    %c0_0 = arith.constant 0 : index
    %0 = vector.load %arg1[%c0, %c0_0] : memref<8x128xbf16, #tpu.memory_space<vmem>>, vector<8x128xbf16>
    %c0_1 = arith.constant 0 : index
    %c0_2 = arith.constant 0 : index
    %1 = vector.load %arg2[%c0_1, %c0_2] : memref<128x128xbf16, #tpu.memory_space<vmem>>, vector<128x128xbf16>
    %cst = arith.constant dense<0.000000e+00> : vector<8x128xf32>
    %2 = tpu.matmul %0, %1, %cst {dimension_numbers = #tpu.dot_dimension_numbers<[1], [0], [0], [1], [0, 0, 1, 1], [], []>} : vector<8x128xbf16>, vector<128x128xbf16>, vector<8x128xf32> -> vector<8x128xf32>
    %c0_3 = arith.constant 0 : index
    %c0_4 = arith.constant 0 : index
    %3 = vector.load %arg3[%c0_3, %c0_4] : memref<1x128xf32, #tpu.memory_space<vmem>>, vector<1x128xf32>
    %4 = vector.broadcast %3 : vector<1x128xf32> to vector<8x128xf32>
    %5 = arith.addf %2, %4 : vector<8x128xf32>
    %cst_5 = arith.constant 0.000000e+00 : f32
    %6 = vector.broadcast %cst_5 : f32 to vector<8x128xf32>
    %7 = arith.maximumf %5, %6 : vector<8x128xf32>
    %8 = arith.truncf %7 : vector<8x128xf32> to vector<8x128xbf16>
    %c0_6 = arith.constant 0 : index
    %c0_7 = arith.constant 0 : index
    %9 = vector.load %arg4[%c0_6, %c0_7] : memref<128x128xbf16, #tpu.memory_space<vmem>>, vector<128x128xbf16>
    %cst_8 = arith.constant dense<0.000000e+00> : vector<8x128xf32>
    %10 = tpu.matmul %8, %9, %cst_8 {dimension_numbers = #tpu.dot_dimension_numbers<[1], [0], [0], [1], [0, 0, 1, 1], [], []>} : vector<8x128xbf16>, vector<128x128xbf16>, vector<8x128xf32> -> vector<8x128xf32>
    %11 = tpu.iota {dimensions = array<i32: 1>} : vector<8x128xi32>
    %c8_i32 = arith.constant 8 : i32
    %12 = vector.broadcast %c8_i32 : i32 to vector<8x128xi32>
    %13 = arith.cmpi slt, %11, %12 : vector<8x128xi32>
    %cst_9 = arith.constant 0xFF800000 : f32
    %14 = vector.broadcast %cst_9 : f32 to vector<8x128xf32>
    %15 = arith.select %13, %10, %14 : vector<8x128xi1>, vector<8x128xf32>
    %cst_10 = arith.constant dense<0xFF800000> : vector<8xf32>
    %16 = vector.multi_reduction <maximumf>, %15, %cst_10 [1] : vector<8x128xf32> to vector<8xf32>
    %17 = vector.shape_cast %16 : vector<8xf32> to vector<8x1xf32>
    %18 = vector.broadcast %17 : vector<8x1xf32> to vector<8x128xf32>
    %19 = arith.subf %15, %18 : vector<8x128xf32>
    %20 = math.exp %19 : vector<8x128xf32>
    %cst_11 = arith.constant dense<0.000000e+00> : vector<8xf32>
    %21 = vector.multi_reduction <add>, %20, %cst_11 [1] : vector<8x128xf32> to vector<8xf32>
    %22 = vector.shape_cast %21 : vector<8xf32> to vector<8x1xf32>
    %23 = tpu.reciprocal %22 {approx = true} : vector<8x1xf32> -> vector<8x1xf32>
    %24 = vector.broadcast %23 : vector<8x1xf32> to vector<8x128xf32>
    %25 = arith.mulf %20, %24 : vector<8x128xf32>
    %c0_12 = arith.constant 0 : index
    %c0_13 = arith.constant 0 : index
    %26 = vector.load %arg5[%c0_12, %c0_13] : memref<8x128xf32, #tpu.memory_space<vmem>>, vector<8x128xf32>
    tpu.vector_store %arg5[%c0_12, %c0_13], %25 {strides = array<i32>} : memref<8x128xf32, #tpu.memory_space<vmem>>, vector<8x128xf32>,
    return
  }
  func.func @transform_0(%arg0: i32) -> (i32, i32) {
    %c0_i32 = arith.constant 0 : i32
    %c0_i32_0 = arith.constant 0 : i32
    return %arg0, %c0_i32 : i32, i32
  }
  func.func @transform_1(%arg0: i32) -> (i32, i32) {
    %c0_i32 = arith.constant 0 : i32
    %c0_i32_0 = arith.constant 0 : i32
    %c0_i32_1 = arith.constant 0 : i32
    return %c0_i32, %c0_i32_0 : i32, i32
  }
  func.func @transform_2(%arg0: i32) -> (i32, i32) {
    %c0_i32 = arith.constant 0 : i32
    %c0_i32_0 = arith.constant 0 : i32
    %c0_i32_1 = arith.constant 0 : i32
    return %c0_i32, %c0_i32_0 : i32, i32
  }
  func.func @transform_3(%arg0: i32) -> (i32, i32) {
    %c0_i32 = arith.constant 0 : i32
    %c0_i32_0 = arith.constant 0 : i32
    %c0_i32_1 = arith.constant 0 : i32
    return %c0_i32, %c0_i32_0 : i32, i32
  }
  func.func @transform_4(%arg0: i32) -> (i32, i32) {
    %c0_i32 = arith.constant 0 : i32
    %c0_i32_0 = arith.constant 0 : i32
    return %arg0, %c0_i32 : i32, i32
  }
}

</mosaic_0001>

<bundles_post_ra>
// kernel: tpu_custom_call.1
= control target key start
LH: loop header
LB: loop body
LE: loop exit
PB: predicated region body
PF: predicated region fallthrough
CT: control target
= control target key end

     0   :  { %9 = vsyncpa [#allocation3], 0  ;;  %s593_s0 = inlined_call_operand.hbm [shape: bf16[8,128], index: 0, kind: input, shape index: {}]   ;;  %s594_s1 = inlined_call_operand.hbm [shape: bf16[128,128], index: 1, kind: input, shape index: {}]   ;;  %s595_s2 = inlined_call_operand.vmem [shape: f32[1,128], index: 2, kind: input, shape index: {}]   ;;  %s596_s3 = inlined_call_operand.hbm [shape: bf16[128,128], index: 3, kind: input, shape index: {}]   ;;  %s597_s4 = inlined_call_operand.hbm [shape: f32[8,128], index: 4, kind: output, shape index: {}]  }
   0x1   :  { %10 = vsyncpa [#allocation6], 0 }
   0x2   :  { %11 = vsyncpa [#allocation4], 0  ;;  %s503_s15 = smov [#allocation5]   ;;  %s409_s19 = scalar_lea.hbm %s594_s1, 1024 }
   0x3   :  { %s27_s16 = sshll.u32 %s503_s15, 4  ;;  %p410_p0 = scmp.ne.s32.totalorder %s594_s1, %s409_s19  ;;  %s28_s16 = int_to_ptr.vmem [resolvable:$true] %s27_s16 }
   0x4   :  { %p413_p1 = scmp.lt.u32.totalorder %s409_s19, %s594_s1 }
   0x6   :  { %p415_p2 = pnand %p413_p1, %p410_p0 }
   0x8   :  { %418 = shalt.err (!%p415_p2)
}
   0x9   :  { %s419_s24 = scalar_lea.vmem %s28_s16, 1024  ;;  %p424_p4 = scmp.lt.s32.totalorder %s28_s16, %s28_s16 }
   0xa   :  { %p420_p3 = scmp.ne.s32.totalorder %s28_s16, %s419_s24  ;;  %p425_p5 = scmp.lt.s32.totalorder %s419_s24, %s419_s24 }
   0xc   :  { %p426_p6 = por %p425_p5, %p424_p4 }
   0xe   :  { %p427_p7 = pnand %p426_p6, %p420_p3 }
  0x10   :  { %430 = shalt.err (!%p427_p7)
}
  0x11   :  { %s504_s25 = smov 64   ;;  %s505_s26 = smov 4  }
  0x12   :  { %33 = dma.hbm_to_vmem [thread:$0]  %s594_s1, 1024, %s28_s16, [#allocation6], %s504_s25, %s504_s25, %s505_s26  }
  0x13   :  { %s506_s29 = smov [#allocation2]   ;;  %s507_s5 = smov [#allocation7]  }
  0x14   :  { %s18_s30 = sshll.u32 %s506_s29, 4  ;;  %s41_s6 = sshll.u32 %s507_s5, 4  ;;  %s19_s30 = int_to_ptr.vmem [resolvable:$true] %s18_s30  ;;  %s42_s6 = int_to_ptr.vmem [resolvable:$true] %s41_s6 }
  0x15   :  { %s431_s9 = scalar_lea.hbm %s593_s0, 64 }
  0x16   :  { %p432_p8 = scmp.ne.s32.totalorder %s593_s0, %s431_s9  ;;  %p435_p9 = scmp.lt.u32.totalorder %s431_s9, %s593_s0 }
  0x18   :  { %p437_p10 = pnand %p435_p9, %p432_p8 }
  0x1a   :  { %440 = shalt.err (!%p437_p10)
}
  0x1b   :  { %s441_s1 = scalar_lea.vmem %s19_s30, 64  ;;  %p446_p12 = scmp.lt.s32.totalorder %s19_s30, %s19_s30 }
  0x1c   :  { %p442_p11 = scmp.ne.s32.totalorder %s19_s30, %s441_s1  ;;  %p447_p13 = scmp.lt.s32.totalorder %s441_s1, %s441_s1 }
  0x1e   :  { %p448_p0 = por %p447_p13, %p446_p12 }
  0x20   :  { %p449_p1 = pnand %p448_p0, %p442_p11 }
  0x22   :  { %452 = shalt.err (!%p449_p1)
}
  0x23   :  { %21 = dma.hbm_to_vmem [thread:$0]  %s593_s0, 64, %s19_s30, [#allocation3]  }
  0x24   :  { %s453_s18 = scalar_lea.hbm %s596_s3, 1024 }
  0x25   :  { %p454_p2 = scmp.ne.s32.totalorder %s596_s3, %s453_s18  ;;  %p457_p3 = scmp.lt.u32.totalorder %s453_s18, %s596_s3 }
  0x27   :  { %p459_p4 = pnand %p457_p3, %p454_p2 }
  0x29   :  { %462 = shalt.err (!%p459_p4)
}
  0x2a   :  { %s463_s23 = scalar_lea.vmem %s42_s6, 1024  ;;  %p468_p6 = scmp.lt.s32.totalorder %s42_s6, %s42_s6 }
  0x2b   :  { %p464_p5 = scmp.ne.s32.totalorder %s42_s6, %s463_s23  ;;  %p469_p7 = scmp.lt.s32.totalorder %s463_s23, %s463_s23 }
  0x2d   :  { %p470_p8 = por %p469_p7, %p468_p6 }
  0x2f   :  { %p471_p9 = pnand %p470_p8, %p464_p5 }
  0x31   :  { %474 = shalt.err (!%p471_p9)
}
  0x32   :  { %47 = dma.hbm_to_vmem [thread:$0]  %s596_s3, 1024, %s42_s6, [#allocation6], %s504_s25, %s504_s25, %s505_s26  }
  0x33   :  { %497 = dma.done.wait [#allocation3], 64  }
  0x34   :  { %498 = vsyncadd [#allocation3], 4294967232 }
  0x35   :  { %499 = dma.done.wait [#allocation6], 2048  }
  0x36   :  { %500 = vsyncadd [#allocation6], 4294965248  ;;  %v508_v0 = vmov 0.0   ;;  %vm509_vm0 = vmmov 0   ;;  %v389_v1 = vld [vmem:[#allocation5] sm:$0xff]   ;;  %v390_v2 = vld [vmem:[#allocation5 + $0x8] sm:$0xff]   ;;  %v276_v26 = vlaneseq }
  0x37   :  { %341 = vmatprep.subr.bf16.mxu0 %v508_v0  ;;  %357 = vmatprep.mubr.msk.bf16.mxu0 %vm509_vm0, %v508_v0  ;;  %v391_v3 = vld [vmem:[#allocation5 + $0x10] sm:$0xff]   ;;  %v397_v4 = vld [vmem:[#allocation7] sm:$0xff]   ;;  %v392_v5 = vld [vmem:[#allocation5 + $0x18] sm:$0xff]  }
  0x38   :  { %361 = vmatprep.subr.bf16.mxu1 %v508_v0  ;;  %377 = vmatprep.mubr.msk.bf16.mxu1 %vm509_vm0, %v508_v0  ;;  %v398_v6 = vld [vmem:[#allocation7 + $0x8] sm:$0xff]   ;;  %v393_v7 = vld [vmem:[#allocation5 + $0x20] sm:$0xff]   ;;  %v399_v8 = vld [vmem:[#allocation7 + $0x10] sm:$0xff]   ;;  %v277_v27 = vand.u32 127, %v276_v26 }
  0x39   :  { %342 = vmatpush3.bf16.msra.mxu0 %v389_v1  ;;  %362 = vmatpush3.bf16.msra.mxu1 %v397_v4  ;;  %v394_v9 = vld [vmem:[#allocation5 + $0x28] sm:$0xff]   ;;  %v400_v10 = vld [vmem:[#allocation7 + $0x18] sm:$0xff]   ;;  %v395_v11 = vld [vmem:[#allocation5 + $0x30] sm:$0xff]  }
  0x3a   :  { %343 = vmatprep.subr.bf16.mxu0 %v508_v0  ;;  %363 = vmatprep.subr.bf16.mxu1 %v508_v0  ;;  %v401_v12 = vld [vmem:[#allocation7 + $0x20] sm:$0xff]   ;;  %v396_v13 = vld [vmem:[#allocation5 + $0x38] sm:$0xff]   ;;  %v402_v14 = vld [vmem:[#allocation7 + $0x28] sm:$0xff]   ;;  %vm278_vm1 = vcmp.lt.s32.totalorder %v277_v27, 8 }
  0x3b   :  { %v58_v15 = vld [vmem:[#allocation2] sm:$0xf]  ;;  %v403_v16 = vld [vmem:[#allocation7 + $0x30] sm:$0xff]  }
  0x3c   :  { %v404_v17 = vld [vmem:[#allocation7 + $0x38] sm:$0xff]  }
  0x3d   :  { %344 = vmatpush3.bf16.msra.mxu0 %v390_v2  ;;  %364 = vmatpush3.bf16.msra.mxu1 %v398_v6  ;;  %v306_v18 = vld [vmem:[%s595_s2] ss:$0 sm:$0xff]  ;;  %s510_s2 = smov [#allocation8]  }
  0x3e   :  { %345 = vmatprep.subr.bf16.mxu0 %v508_v0  ;;  %365 = vmatprep.subr.bf16.mxu1 %v508_v0  ;;  %s296_s26 = sshll.u32 %s510_s2, 4  ;;  %s297_s26 = int_to_ptr.vmem [resolvable:$true] %s296_s26 }
  0x3f   :  { %s475_s27 = scalar_lea.vmem %s297_s26, 128  ;;  %p480_p11 = scmp.lt.s32.totalorder %s297_s26, %s297_s26 }
  0x40   :  { %p476_p10 = scmp.ne.s32.totalorder %s297_s26, %s475_s27  ;;  %p481_p12 = scmp.lt.s32.totalorder %s475_s27, %s475_s27 }
  0x41   :  { %346 = vmatpush3.bf16.msra.mxu0 %v391_v3  ;;  %366 = vmatpush3.bf16.msra.mxu1 %v399_v8 }
  0x42   :  { %347 = vmatprep.subr.bf16.mxu0 %v508_v0  ;;  %367 = vmatprep.subr.bf16.mxu1 %v508_v0  ;;  %p482_p13 = por %p481_p12, %p480_p11 }
  0x44   :  { %p483_p0 = pnand %p482_p13, %p476_p10 }
  0x45   :  { %348 = vmatpush3.bf16.msra.mxu0 %v392_v5  ;;  %368 = vmatpush3.bf16.msra.mxu1 %v400_v10 }
  0x46   :  { %349 = vmatprep.subr.bf16.mxu0 %v508_v0  ;;  %369 = vmatprep.subr.bf16.mxu1 %v508_v0 }
  0x49   :  { %350 = vmatpush3.bf16.msra.mxu0 %v393_v7  ;;  %370 = vmatpush3.bf16.msra.mxu1 %v401_v12 }
  0x4a   :  { %351 = vmatprep.subr.bf16.mxu0 %v508_v0  ;;  %371 = vmatprep.subr.bf16.mxu1 %v508_v0 }
  0x4d   :  { %352 = vmatpush3.bf16.msra.mxu0 %v394_v9  ;;  %372 = vmatpush3.bf16.msra.mxu1 %v402_v14 }
  0x4e   :  { %353 = vmatprep.subr.bf16.mxu0 %v508_v0  ;;  %373 = vmatprep.subr.bf16.mxu1 %v508_v0 }
  0x51   :  { %354 = vmatpush3.bf16.msra.mxu0 %v395_v11  ;;  %374 = vmatpush3.bf16.msra.mxu1 %v403_v16 }
  0x52   :  { %355 = vmatprep.subr.bf16.mxu0 %v508_v0  ;;  %375 = vmatprep.subr.bf16.mxu1 %v508_v0 }
  0x55   :  { %356 = vmatpush3.bf16.msra.mxu0 %v396_v13  ;;  %376 = vmatpush3.bf16.msra.mxu1 %v404_v17 }
  0x58   :  { %358 = vmatmul.mubr.bf16.vlgmr.msra.gmra.mrb[0].mxu0 %v58_v15 }
 0x12b   :  { %v164_v19 = vpop.f32.mrb[0].mxu0 }
 0x12c   :  { %v165_v20 = vadd.f32 %v306_v18, %v164_v19  ;;  %v359_v21 = vpop.f32.mrb[1].mxu0 }
 0x12d   :  { %v167_v22 = vpop.f32.mrb[2].mxu0 }
 0x12e   :  { %v170_v23 = vmax.f32 %v165_v20, 0.0  ;;  %v360_v24 = vpop.f32.mrb[3].mxu0 }
 0x130   :  { %v171_v25 = vpack.c.bf16 %v170_v23, %v170_v23 }
 0x132   :  { %378 = vmatmul.mubr.bf16.vlgmr.msra.gmra.mrb[0].mxu1 %v171_v25 }
 0x205   :  { %v270_v28 = vpop.f32.mrb[0].mxu1 }
 0x206   :  { %v379_v29 = vpop.f32.mrb[1].mxu1  ;;  %v279_v30 = vsel %vm278_vm1, %v270_v28, -inf }
 0x207   :  { %280 = vmax.xlane.f32.xlu0 %v279_v30  ;;  %v273_v31 = vpop.f32.mrb[2].mxu1 }
 0x208   :  { %v380_v32 = vpop.f32.mrb[3].mxu1 }
 0x294   :  { %v281_v33 = vpop.xlane.xlu0 %280 }
 0x295   :  { %v282_v34 = vsub.f32 %v279_v30, %v281_v33 }
 0x297   :  { %v283_v35 = vmul.f32 1.442695, %v282_v34 }
 0x299   :  { %405 = vpow2.f32 %v283_v35 }
 0x2a3   :  { %v406_v36 = vpop.eup %405 }
 0x2a4   :  { %285 = vadd.xlane.f32.xlu0 %v406_v36 }
 0x331   :  { %v286_v37 = vpop.xlane.xlu0 %285 }
 0x332   :  { %407 = vrcp.f32 %v286_v37 }
 0x33c   :  { %v408_v38 = vpop.eup %407 }
 0x33d   :  { %v288_v39 = vmul.f32 %v408_v38, %v406_v36 }
 0x33f   :  { %289 = vst [vmem:[#allocation8] sm:$0xff] %v288_v39 }
 0x340   :  { %486 = shalt.err (!%p483_p0)
}
 0x341   :  { %s487_s30 = scalar_lea.hbm %s597_s4, 128 }
 0x342   :  { %p488_p1 = scmp.ne.s32.totalorder %s597_s4, %s487_s30  ;;  %p491_p2 = scmp.lt.u32.totalorder %s487_s30, %s597_s4 }
 0x344   :  { %p493_p3 = pnand %p491_p2, %p488_p1 }
 0x346   :  { %496 = shalt.err (!%p493_p3)
}
 0x347   :  { %299 = dma.vmem_to_hbm [thread:$0]  %s297_s26, 128, %s597_s4, [#allocation4]  }
 0x348   :  { %501 = dma.done.wait [#allocation4], 128  }
 0x349   :  { %502 = vsyncadd [#allocation4], 4294967168 }
 0x34a   :  { %303 = vsyncpa [#allocation3], 1 }
 0x34b   :  { %304 = vsyncpa [#allocation6], 1 }
 0x34c   :  { %305 = vsyncpa [#allocation4], 1 }

</bundles_post_ra>
